<compile_context>
chip_gen: v7x
topology: tpu7x:2x2x1
jax: 0.10.0
libtpu: 0.0.40
codegen_flags: <defaults>
</compile_context>

<pallas_src>
import jax
import jax.numpy as jnp
import numpy as np
from jax.experimental import pallas as pl
from jax.experimental.pallas import tpu as pltpu

# ---- synthetic ModelArgs (small, lane-dense, consistent with the forward) ----
DIM = 128              # args.dim  (multiple of 128 -> lane-dense blocks)
MOE_INTER_DIM = 128    # args.moe_inter_dim (must equal DIM, see note above)
N_ROUTED_EXPERTS = 8   # args.n_routed_experts
N_ACTIVATED_EXPERTS = 2
BATCH, SEQ = 2, 8
WORLD_SIZE = 1         # torch.distributed not initialized
NUM_LOCAL_EXPERTS = N_ROUTED_EXPERTS // WORLD_SIZE
TOP_K = min(N_ACTIVATED_EXPERTS, NUM_LOCAL_EXPERTS)


# ------------------------- fused Pallas kernel -------------------------

def moe_fused_kernel(x_ref, wr_ref, w1_ref, w3_ref, w2_ref, o_ref):
    """Router + softmax + top-k gating + shared-expert FFN + expert-row combine.

    x_ref   : (TM, D)    bf16  token tile (streamed)
    wr_ref  : (D, E)     bf16  router weight (resident, single-buffered)
    w1/w3/w2: bf16 FFN weights (resident, single-buffered)
    o_ref   : (1, E, D)  f32   per-super-block expert-row partial accumulator,
                               revisited across the inner (token) grid axis.
    """
    n_experts = wr_ref.shape[1]

    # Init this super-block's partial accumulator once, accumulate every tile.
    @pl.when(pl.program_id(1) == 0)
    def _init():
        o_ref[...] = jnp.zeros_like(o_ref)

    xb = x_ref[...]                                             # bf16 MXU input

    # ---- router(x) + softmax (probs never touch HBM) ----
    logits = jnp.dot(xb, wr_ref[...], preferred_element_type=jnp.float32)
    logits = logits - jnp.max(logits, axis=-1, keepdims=True)
    e = jnp.exp(logits)
    probs = e * pl.reciprocal(jnp.sum(e, axis=-1, keepdims=True), approx=True)

    # ---- top-k + gate normalization, in-register (k tiny & static -> unrolled
    #      iterative argmax; first-occurrence tie-break matches torch.topk) ----
    col = jax.lax.broadcasted_iota(jnp.int32, probs.shape, 1)   # (TM, E)
    remaining = probs
    gates = jnp.zeros_like(probs)                               # selected gates
    gate_sum = jnp.zeros(probs.shape[:1] + (1,), jnp.float32)   # (TM, 1)
    for _ in range(TOP_K):
        mx = jnp.max(remaining, axis=-1, keepdims=True)
        amax = jnp.min(jnp.where(remaining == mx, col, n_experts),
                       axis=-1, keepdims=True)
        sel = col == amax
        gates = gates + jnp.where(sel, remaining, 0.0)
        gate_sum = gate_sum + mx
        remaining = jnp.where(sel, -jnp.inf, remaining)
    # The approx-reciprocal softmax scale cancels exactly in this ratio.
    gates = gates * pl.reciprocal(gate_sum, approx=True)        # routes_k / sum

    # ---- shared expert FFN (identical for every top-k slot, as in reference).
    #      bf16 cast folded into each silu epilogue -> only one f32 temp live.
    h = jax.nn.silu(jnp.dot(xb, w1_ref[...],
                            preferred_element_type=jnp.float32)).astype(jnp.bfloat16)
    h = jax.nn.silu(jnp.dot(h, w3_ref[...],
                            preferred_element_type=jnp.float32)).astype(jnp.bfloat16)
    h = jnp.dot(h, w2_ref[...], preferred_element_type=jnp.float32)   # (TM, D) f32

    # ---- scatter_add_(0, expert_idx, gate * h):
    #      out[e, :] += sum_i gates[i, e] * h[i, :]   ==  gates^T @ h,
    #      expressed as a TN matmul contracting the token axis.
    combined = jax.lax.dot_general(
        gates, h, dimension_numbers=(((0,), (0,)), ((), ())),
        preferred_element_type=jnp.float32)                     # (E, D)
    o_ref[...] = o_ref[...] + combined[None, :, :]


# ------------------------- wrappers -------------------------

def _choose_tiling(n_tokens):
    """Pick (token_tile, inner_tiles_per_superblock, n_superblocks)."""
    if n_tokens <= 512:
        tm = n_tokens                      # whole slab: one (or few) grid steps
    else:
        tm = None
        for cand in (512, 256, 128):       # big tiles amortize ~0.35us/step
            if n_tokens % cand == 0:
                tm = cand
                break
        # TODO(synk): masked tail tile for arbitrary token counts.
        assert tm is not None, "token count > 512 must be a multiple of 128"
    tiles = n_tokens // tm
    # Leading "parallel" super-block axis -> 2nd TensorCore on v7x; no-op on
    # v5e/v6e (single TC).
    p = 2 if (tiles >= 2 and tiles % 2 == 0) else 1
    return tm, tiles // p, p


def moe_layer_forward(x, params):
    """MoELayer.forward as one fused pallas_call."""
    B, S, D = x.shape
    x2d = x.reshape(-1, D)                      # x.view(-1, hidden_dim)
    N = x2d.shape[0]
    E = params["router"].shape[1]
    I = params["w1"].shape[1]
    # torch.scatter_add_ requires every expert index < N (same constraint here).
    assert E <= N, "n_routed_experts must not exceed the number of tokens"

    TM, inner_tiles, P = _choose_tiling(N)

    # bf16 streamed x + bf16 weights: halve HBM/VMEM bytes, feed the MXU
    # natively; all elementwise math stays f32 in-kernel.
    xb = x2d.astype(jnp.bfloat16)
    wr = params["router"].astype(jnp.bfloat16)
    w1 = params["w1"].astype(jnp.bfloat16)
    w3 = params["w3"].astype(jnp.bfloat16)
    w2 = params["w2"].astype(jnp.bfloat16)

    # TODO(synk): at production dims, K-tile w1/w3/w2 on an extra "arbitrary"
    #             grid axis with a VMEM f32 accumulator and an explicit
    #             vmem_limit_bytes so the weights also fit v7x's 64 MiB VMEM.
    partials = pl.pallas_call(
        moe_fused_kernel,
        out_shape=jax.ShapeDtypeStruct((P, E, D), jnp.float32),
        grid=(P, inner_tiles),
        in_specs=[
            # streamed token tile
            pl.BlockSpec((TM, D), lambda p, i: (p * inner_tiles + i, 0)),
            # resident weights: constant index -> single-buffered
            pl.BlockSpec((D, E), lambda p, i: (0, 0), pipeline_mode=pl.Buffered(1)),
            pl.BlockSpec((D, I), lambda p, i: (0, 0), pipeline_mode=pl.Buffered(1)),
            pl.BlockSpec((I, I), lambda p, i: (0, 0), pipeline_mode=pl.Buffered(1)),
            pl.BlockSpec((I, D), lambda p, i: (0, 0), pipeline_mode=pl.Buffered(1)),
        ],
        # Each super-block owns one (E, D) partial; it is revisited (accumulated)
        # across the inner token axis -> that axis is "arbitrary".
        out_specs=pl.BlockSpec((1, E, D), lambda p, i: (p, 0, 0)),
        compiler_params=pltpu.CompilerParams(
            dimension_semantics=("parallel", "arbitrary")),
    )(xb, wr, w1, w3, w2)

    # Sum the tiny per-core partials and synthesize the zero rows E..N-1 in the
    # wrapper instead of carrying an (N, D) slab through the kernel.
    expert_rows = partials.sum(axis=0)                          # (E, D) f32
    out2d = jnp.zeros((N, D), jnp.float32).at[:E, :].set(expert_rows)
    return out2d.reshape(B, S, D)


def moe_forward(x, params):
    """MoE.forward: base_model output -> MoELayer."""
    # TODO(synk): base_model is an arbitrary user module; treated as identity.
    return moe_layer_forward(x, params)


# ------------------------- plain-JAX reference -------------------------

def moe_ref(x, params):
    """Mirror of the torch forward (same bf16 matmul inputs / f32 accumulation)."""
    B, S, D = x.shape
    x2d = x.reshape(-1, D)
    xb = x2d.astype(jnp.bfloat16)
    wr = params["router"].astype(jnp.bfloat16)
    w1 = params["w1"].astype(jnp.bfloat16)
    w3 = params["w3"].astype(jnp.bfloat16)
    w2 = params["w2"].astype(jnp.bfloat16)

    logits = jnp.dot(xb, wr, preferred_element_type=jnp.float32)
    probs = jax.nn.softmax(logits, axis=-1)
    routes_k, idx_k = jax.lax.top_k(probs, TOP_K)
    rk = routes_k / routes_k.sum(-1, keepdims=True)

    h = jax.nn.silu(jnp.dot(xb, w1, preferred_element_type=jnp.float32))
    h = jnp.dot(h.astype(jnp.bfloat16), w3, preferred_element_type=jnp.float32)
    h = jax.nn.silu(h)
    h = jnp.dot(h.astype(jnp.bfloat16), w2, preferred_element_type=jnp.float32)

    out = jnp.zeros_like(x2d)
    for k in range(TOP_K):      # mirrors the torch loop + scatter_add_ over EXPERT idx
        out = out.at[idx_k[:, k]].add(rk[:, k][:, None] * h)
    return out.reshape(B, S, D)


# ------------------------- main -------------------------

if __name__ == "__main__":
    key = jax.random.PRNGKey(0)
    k1, k2, k3, k4, kx = jax.random.split(key, 5)
    scale = 1.0 / np.sqrt(DIM)
    params = {
        "w1":     jax.random.normal(k1, (DIM, MOE_INTER_DIM), jnp.float32) * scale,
        "w3":     jax.random.normal(k2, (MOE_INTER_DIM, MOE_INTER_DIM), jnp.float32) * scale,
        "w2":     jax.random.normal(k3, (MOE_INTER_DIM, DIM), jnp.float32) * scale,
        "router": jax.random.normal(k4, (DIM, N_ROUTED_EXPERTS), jnp.float32) * scale,
    }
    x = jax.random.normal(kx, (BATCH, SEQ, DIM), jnp.float32)

    out = jax.block_until_ready(moe_forward(x, params))
    ref = jax.block_until_ready(moe_ref(x, params))

    assert out.shape == (BATCH, SEQ, DIM)
    # bf16 MXU inputs on both paths + approx reciprocals -> 1e-2 tolerances.
    np.testing.assert_allclose(np.asarray(out), np.asarray(ref), rtol=1e-2, atol=1e-2)
    print("KERNEL_OK")
</pallas_src>

<mosaic_0001>
module attributes {stable_mosaic.version = 11 : i64} {
  func.func @moe_fused_kernel(%arg0: i32, %arg1: i32, %arg2: memref<16x128xbf16, #tpu.memory_space<vmem>>, %arg3: memref<128x8xbf16, #tpu.memory_space<vmem>>, %arg4: memref<128x128xbf16, #tpu.memory_space<vmem>>, %arg5: memref<128x128xbf16, #tpu.memory_space<vmem>>, %arg6: memref<128x128xbf16, #tpu.memory_space<vmem>>, %arg7: memref<1x8x128xf32, #tpu.memory_space<vmem>>) attributes {dimension_semantics = [#tpu.dimension_semantics<parallel>, #tpu.dimension_semantics<arbitrary>], iteration_bounds = array<i64: 1, 1>, scalar_prefetch = 0 : i64, scratch_operands = 0 : i64, tpu.core_type = #tpu.core_type<tc>, window_params = [{transform_indices = @transform_0, window_bounds = array<i64: 16, 128>}, {pipeline_mode = #tpu.pipeline_mode<synchronous>, transform_indices = @transform_1, window_bounds = array<i64: 128, 8>}, {pipeline_mode = #tpu.pipeline_mode<synchronous>, transform_indices = @transform_2, window_bounds = array<i64: 128, 128>}, {pipeline_mode = #tpu.pipeline_mode<synchronous>, transform_indices = @transform_3, window_bounds = array<i64: 128, 128>}, {pipeline_mode = #tpu.pipeline_mode<synchronous>, transform_indices = @transform_4, window_bounds = array<i64: 128, 128>}, {transform_indices = @transform_5, window_bounds = array<i64: 1, 8, 128>}]} {
    %c0_i32 = arith.constant 0 : i32
    %0 = arith.cmpi eq, %arg1, %c0_i32 : i32
    %1 = arith.extui %0 : i1 to i32
    %c0_i32_0 = arith.constant 0 : i32
    %2 = arith.cmpi ne, %1, %c0_i32_0 : i32
    scf.if %2 {
      %cst_34 = arith.constant 0.000000e+00 : f32
      %77 = vector.broadcast %cst_34 : f32 to vector<1x8x128xf32>
      %c0_35 = arith.constant 0 : index
      %c0_36 = arith.constant 0 : index
      %c0_37 = arith.constant 0 : index
      %78 = vector.load %arg7[%c0_35, %c0_36, %c0_37] : memref<1x8x128xf32, #tpu.memory_space<vmem>>, vector<1x8x128xf32>
      tpu.vector_store %arg7[%c0_35, %c0_36, %c0_37], %77 {strides = array<i32>} : memref<1x8x128xf32, #tpu.memory_space<vmem>>, vector<1x8x128xf32>,
    } else {
    }
    %c0 = arith.constant 0 : index
    %c0_1 = arith.constant 0 : index
    %3 = vector.load %arg2[%c0, %c0_1] : memref<16x128xbf16, #tpu.memory_space<vmem>>, vector<16x128xbf16>
    %c0_2 = arith.constant 0 : index
    %c0_3 = arith.constant 0 : index
    %4 = vector.load %arg3[%c0_2, %c0_3] : memref<128x8xbf16, #tpu.memory_space<vmem>>, vector<128x8xbf16>
    %cst = arith.constant dense<0.000000e+00> : vector<16x8xf32>
    %5 = tpu.matmul %3, %4, %cst {dimension_numbers = #tpu.dot_dimension_numbers<[1], [0], [0], [1], [0, 0, 1, 1], [], []>} : vector<16x128xbf16>, vector<128x8xbf16>, vector<16x8xf32> -> vector<16x8xf32>
    %cst_4 = arith.constant dense<0xFF800000> : vector<16xf32>
    %6 = vector.multi_reduction <maximumf>, %5, %cst_4 [1] : vector<16x8xf32> to vector<16xf32>
    %7 = vector.shape_cast %6 : vector<16xf32> to vector<16x1xf32>
    %8 = vector.broadcast %7 : vector<16x1xf32> to vector<16x8xf32>
    %9 = arith.subf %5, %8 : vector<16x8xf32>
    %10 = math.exp %9 : vector<16x8xf32>
    %cst_5 = arith.constant dense<0.000000e+00> : vector<16xf32>
    %11 = vector.multi_reduction <add>, %10, %cst_5 [1] : vector<16x8xf32> to vector<16xf32>
    %12 = vector.shape_cast %11 : vector<16xf32> to vector<16x1xf32>
    %13 = tpu.reciprocal %12 {approx = true} : vector<16x1xf32> -> vector<16x1xf32>
    %14 = vector.broadcast %13 : vector<16x1xf32> to vector<16x8xf32>
    %15 = arith.mulf %10, %14 : vector<16x8xf32>
    %16 = tpu.iota {dimensions = array<i32: 1>} : vector<16x8xi32>
    %cst_6 = arith.constant 0.000000e+00 : f32
    %17 = vector.broadcast %cst_6 : f32 to vector<16x8xf32>
    %cst_7 = arith.constant 0.000000e+00 : f32
    %18 = vector.broadcast %cst_7 : f32 to vector<16x1xf32>
    %cst_8 = arith.constant dense<0xFF800000> : vector<16xf32>
    %19 = vector.multi_reduction <maximumf>, %15, %cst_8 [1] : vector<16x8xf32> to vector<16xf32>
    %20 = vector.shape_cast %19 : vector<16xf32> to vector<16x1xf32>
    %21 = vector.broadcast %20 : vector<16x1xf32> to vector<16x8xf32>
    %22 = arith.cmpf oeq, %15, %21 : vector<16x8xf32>
    %c8_i32 = arith.constant 8 : i32
    %23 = vector.broadcast %c8_i32 : i32 to vector<16x8xi32>
    %24 = arith.select %22, %16, %23 : vector<16x8xi1>, vector<16x8xi32>
    %cst_9 = arith.constant dense<2147483647> : vector<16xi32>
    %25 = vector.multi_reduction <minsi>, %24, %cst_9 [1] : vector<16x8xi32> to vector<16xi32>
    %26 = vector.shape_cast %25 : vector<16xi32> to vector<16x1xi32>
    %27 = vector.broadcast %26 : vector<16x1xi32> to vector<16x8xi32>
    %28 = arith.cmpi eq, %16, %27 : vector<16x8xi32>
    %cst_10 = arith.constant 0.000000e+00 : f32
    %29 = vector.broadcast %cst_10 : f32 to vector<16x8xf32>
    %30 = arith.select %28, %15, %29 : vector<16x8xi1>, vector<16x8xf32>
    %31 = arith.addf %17, %30 : vector<16x8xf32>
    %32 = arith.addf %18, %20 : vector<16x1xf32>
    %cst_11 = arith.constant 0xFF800000 : f32
    %33 = vector.broadcast %cst_11 : f32 to vector<16x8xf32>
    %34 = arith.select %28, %33, %15 : vector<16x8xi1>, vector<16x8xf32>
    %cst_12 = arith.constant dense<0xFF800000> : vector<16xf32>
    %35 = vector.multi_reduction <maximumf>, %34, %cst_12 [1] : vector<16x8xf32> to vector<16xf32>
    %36 = vector.shape_cast %35 : vector<16xf32> to vector<16x1xf32>
    %37 = vector.broadcast %36 : vector<16x1xf32> to vector<16x8xf32>
    %38 = arith.cmpf oeq, %34, %37 : vector<16x8xf32>
    %c8_i32_13 = arith.constant 8 : i32
    %39 = vector.broadcast %c8_i32_13 : i32 to vector<16x8xi32>
    %40 = arith.select %38, %16, %39 : vector<16x8xi1>, vector<16x8xi32>
    %cst_14 = arith.constant dense<2147483647> : vector<16xi32>
    %41 = vector.multi_reduction <minsi>, %40, %cst_14 [1] : vector<16x8xi32> to vector<16xi32>
    %42 = vector.shape_cast %41 : vector<16xi32> to vector<16x1xi32>
    %43 = vector.broadcast %42 : vector<16x1xi32> to vector<16x8xi32>
    %44 = arith.cmpi eq, %16, %43 : vector<16x8xi32>
    %cst_15 = arith.constant 0.000000e+00 : f32
    %45 = vector.broadcast %cst_15 : f32 to vector<16x8xf32>
    %46 = arith.select %44, %34, %45 : vector<16x8xi1>, vector<16x8xf32>
    %47 = arith.addf %31, %46 : vector<16x8xf32>
    %48 = arith.addf %32, %36 : vector<16x1xf32>
    %49 = tpu.reciprocal %48 {approx = true} : vector<16x1xf32> -> vector<16x1xf32>
    %50 = vector.broadcast %49 : vector<16x1xf32> to vector<16x8xf32>
    %51 = arith.mulf %47, %50 : vector<16x8xf32>
    %c0_16 = arith.constant 0 : index
    %c0_17 = arith.constant 0 : index
    %52 = vector.load %arg4[%c0_16, %c0_17] : memref<128x128xbf16, #tpu.memory_space<vmem>>, vector<128x128xbf16>
    %cst_18 = arith.constant dense<0.000000e+00> : vector<16x128xf32>
    %53 = tpu.matmul %3, %52, %cst_18 {dimension_numbers = #tpu.dot_dimension_numbers<[1], [0], [0], [1], [0, 0, 1, 1], [], []>} : vector<16x128xbf16>, vector<128x128xbf16>, vector<16x128xf32> -> vector<16x128xf32>
    %54 = arith.negf %53 : vector<16x128xf32>
    %55 = math.exp %54 : vector<16x128xf32>
    %cst_19 = arith.constant 1.000000e+00 : f32
    %56 = vector.broadcast %cst_19 : f32 to vector<16x128xf32>
    %57 = arith.addf %56, %55 : vector<16x128xf32>
    %58 = arith.divf %56, %57 : vector<16x128xf32>
    %59 = arith.mulf %53, %58 : vector<16x128xf32>
    %60 = arith.truncf %59 : vector<16x128xf32> to vector<16x128xbf16>
    %c0_20 = arith.constant 0 : index
    %c0_21 = arith.constant 0 : index
    %61 = vector.load %arg5[%c0_20, %c0_21] : memref<128x128xbf16, #tpu.memory_space<vmem>>, vector<128x128xbf16>
    %cst_22 = arith.constant dense<0.000000e+00> : vector<16x128xf32>
    %62 = tpu.matmul %60, %61, %cst_22 {dimension_numbers = #tpu.dot_dimension_numbers<[1], [0], [0], [1], [0, 0, 1, 1], [], []>} : vector<16x128xbf16>, vector<128x128xbf16>, vector<16x128xf32> -> vector<16x128xf32>
    %63 = arith.negf %62 : vector<16x128xf32>
    %64 = math.exp %63 : vector<16x128xf32>
    %cst_23 = arith.constant 1.000000e+00 : f32
    %65 = vector.broadcast %cst_23 : f32 to vector<16x128xf32>
    %66 = arith.addf %65, %64 : vector<16x128xf32>
    %67 = arith.divf %65, %66 : vector<16x128xf32>
    %68 = arith.mulf %62, %67 : vector<16x128xf32>
    %69 = arith.truncf %68 : vector<16x128xf32> to vector<16x128xbf16>
    %c0_24 = arith.constant 0 : index
    %c0_25 = arith.constant 0 : index
    %70 = vector.load %arg6[%c0_24, %c0_25] : memref<128x128xbf16, #tpu.memory_space<vmem>>, vector<128x128xbf16>
    %cst_26 = arith.constant dense<0.000000e+00> : vector<16x128xf32>
    %71 = tpu.matmul %69, %70, %cst_26 {dimension_numbers = #tpu.dot_dimension_numbers<[1], [0], [0], [1], [0, 0, 1, 1], [], []>} : vector<16x128xbf16>, vector<128x128xbf16>, vector<16x128xf32> -> vector<16x128xf32>
    %cst_27 = arith.constant dense<0.000000e+00> : vector<8x128xf32>
    %72 = tpu.matmul %51, %71, %cst_27 {dimension_numbers = #tpu.dot_dimension_numbers<[0], [0], [1], [1], [0, 1, 1, 1], [], []>} : vector<16x8xf32>, vector<16x128xf32>, vector<8x128xf32> -> vector<8x128xf32>
    %c0_28 = arith.constant 0 : index
    %c0_29 = arith.constant 0 : index
    %c0_30 = arith.constant 0 : index
    %73 = vector.load %arg7[%c0_28, %c0_29, %c0_30] : memref<1x8x128xf32, #tpu.memory_space<vmem>>, vector<1x8x128xf32>
    %74 = vector.shape_cast %72 : vector<8x128xf32> to vector<1x8x128xf32>
    %75 = arith.addf %73, %74 : vector<1x8x128xf32>
    %c0_31 = arith.constant 0 : index
    %c0_32 = arith.constant 0 : index
    %c0_33 = arith.constant 0 : index
    %76 = vector.load %arg7[%c0_31, %c0_32, %c0_33] : memref<1x8x128xf32, #tpu.memory_space<vmem>>, vector<1x8x128xf32>
    tpu.vector_store %arg7[%c0_31, %c0_32, %c0_33], %75 {strides = array<i32>} : memref<1x8x128xf32, #tpu.memory_space<vmem>>, vector<1x8x128xf32>,
    return
  }
  func.func @transform_0(%arg0: i32, %arg1: i32) -> (i32, i32) {
    %c1_i32 = arith.constant 1 : i32
    %0 = arith.muli %arg0, %c1_i32 : i32
    %1 = arith.addi %0, %arg1 : i32
    %c0_i32 = arith.constant 0 : i32
    %c0_i32_0 = arith.constant 0 : i32
    return %1, %c0_i32 : i32, i32
  }
  func.func @transform_1(%arg0: i32, %arg1: i32) -> (i32, i32) {
    %c0_i32 = arith.constant 0 : i32
    %c0_i32_0 = arith.constant 0 : i32
    %c0_i32_1 = arith.constant 0 : i32
    return %c0_i32, %c0_i32_0 : i32, i32
  }
  func.func @transform_2(%arg0: i32, %arg1: i32) -> (i32, i32) {
    %c0_i32 = arith.constant 0 : i32
    %c0_i32_0 = arith.constant 0 : i32
    %c0_i32_1 = arith.constant 0 : i32
    return %c0_i32, %c0_i32_0 : i32, i32
  }
  func.func @transform_3(%arg0: i32, %arg1: i32) -> (i32, i32) {
    %c0_i32 = arith.constant 0 : i32
    %c0_i32_0 = arith.constant 0 : i32
    %c0_i32_1 = arith.constant 0 : i32
    return %c0_i32, %c0_i32_0 : i32, i32
  }
  func.func @transform_4(%arg0: i32, %arg1: i32) -> (i32, i32) {
    %c0_i32 = arith.constant 0 : i32
    %c0_i32_0 = arith.constant 0 : i32
    %c0_i32_1 = arith.constant 0 : i32
    return %c0_i32, %c0_i32_0 : i32, i32
  }
  func.func @transform_5(%arg0: i32, %arg1: i32) -> (i32, i32, i32) {
    %c0_i32 = arith.constant 0 : i32
    %c0_i32_0 = arith.constant 0 : i32
    %c0_i32_1 = arith.constant 0 : i32
    return %arg0, %c0_i32, %c0_i32_0 : i32, i32, i32
  }
}

</mosaic_0001>

<bundles_post_ra>
// kernel: tpu_custom_call.1
= control target key start
LH: loop header
LB: loop body
LE: loop exit
PB: predicated region body
PF: predicated region fallthrough
CT: control target
= control target key end

     0   :  { %10 = vsyncpa [#allocation3], 0  ;;  %s1342_s0 = inlined_call_operand.vmem [shape: bf16[16,128], index: 0, kind: input, shape index: {}]   ;;  %s1343_s1 = inlined_call_operand.vmem [shape: bf16[128,8], index: 1, kind: input, shape index: {}]   ;;  %s1344_s2 = inlined_call_operand.vmem [shape: bf16[128,128], index: 2, kind: input, shape index: {}]   ;;  %s1345_s3 = inlined_call_operand.hbm [shape: bf16[128,128], index: 3, kind: input, shape index: {}]   ;;  %s1346_s4 = inlined_call_operand.hbm [shape: bf16[128,128], index: 4, kind: input, shape index: {}]   ;;  %s1347_s5 = inlined_call_operand.hbm [shape: f32[1,8,128], index: 5, kind: output, shape index: {}]  }
   0x1   :  { %11 = vsyncpa [#allocation6], 0 }
   0x2   :  { %12 = vsyncpa [#allocation4], 0  ;;  %s1101_s18 = smov [#allocation2]   ;;  %s1029_s22 = scalar_lea.hbm %s1345_s3, 1024 }
   0x3   :  { %s32_s19 = sshll.u32 %s1101_s18, 4  ;;  %p1030_p0 = scmp.ne.s32.totalorder %s1345_s3, %s1029_s22  ;;  %s33_s19 = int_to_ptr.vmem [resolvable:$true] %s32_s19 }
   0x4   :  { %p1033_p1 = scmp.lt.u32.totalorder %s1029_s22, %s1345_s3 }
   0x6   :  { %p1035_p2 = pnand %p1033_p1, %p1030_p0 }
   0x8   :  { %1038 = shalt.err (!%p1035_p2)
}
   0x9   :  { %s1039_s27 = scalar_lea.vmem %s33_s19, 1024  ;;  %p1044_p4 = scmp.lt.s32.totalorder %s33_s19, %s33_s19 }
   0xa   :  { %p1040_p3 = scmp.ne.s32.totalorder %s33_s19, %s1039_s27  ;;  %p1045_p5 = scmp.lt.s32.totalorder %s1039_s27, %s1039_s27 }
   0xc   :  { %p1046_p6 = por %p1045_p5, %p1044_p4 }
   0xe   :  { %p1047_p7 = pnand %p1046_p6, %p1040_p3 }
  0x10   :  { %1050 = shalt.err (!%p1047_p7)
}
  0x11   :  { %s1102_s28 = smov 64   ;;  %s1103_s29 = smov 4  }
  0x12   :  { %38 = dma.hbm_to_vmem [thread:$0]  %s1345_s3, 1024, %s33_s19, [#allocation3], %s1102_s28, %s1102_s28, %s1103_s29  }
  0x13   :  { %s1104_s7 = smov [#allocation5]   ;;  %s1051_s11 = scalar_lea.hbm %s1346_s4, 1024 }
  0x14   :  { %s44_s8 = sshll.u32 %s1104_s7, 4  ;;  %p1052_p8 = scmp.ne.s32.totalorder %s1346_s4, %s1051_s11  ;;  %s45_s8 = int_to_ptr.vmem [resolvable:$true] %s44_s8 }
  0x15   :  { %p1055_p9 = scmp.lt.u32.totalorder %s1051_s11, %s1346_s4 }
  0x17   :  { %p1057_p10 = pnand %p1055_p9, %p1052_p8 }
  0x19   :  { %1060 = shalt.err (!%p1057_p10)
}
  0x1a   :  { %s1061_s16 = scalar_lea.vmem %s45_s8, 1024  ;;  %p1066_p12 = scmp.lt.s32.totalorder %s45_s8, %s45_s8 }
  0x1b   :  { %p1062_p11 = scmp.ne.s32.totalorder %s45_s8, %s1061_s16  ;;  %p1067_p13 = scmp.lt.s32.totalorder %s1061_s16, %s1061_s16 }
  0x1d   :  { %p1068_p0 = por %p1067_p13, %p1066_p12 }
  0x1f   :  { %p1069_p1 = pnand %p1068_p0, %p1062_p11 }
  0x21   :  { %1072 = shalt.err (!%p1069_p1)
}
  0x22   :  { %50 = dma.hbm_to_vmem [thread:$0]  %s1346_s4, 1024, %s45_s8, [#allocation6], %s1102_s28, %s1102_s28, %s1103_s29  }
  0x23   :  { %1095 = dma.done.wait [#allocation3], 1024  }
  0x24   :  { %1096 = vsyncadd [#allocation3], 4294966272 }
  0x25   :  { %1097 = dma.done.wait [#allocation6], 1024  }
  0x26   :  { %1098 = vsyncadd [#allocation6], 4294966272  ;;  %v1105_v0 = vmov 0.0   ;;  %vm1106_vm0 = vmmov 0   ;;  %v968_v1 = vld [vmem:[%s1343_s1] sm:$0xff]   ;;  %v969_v2 = vld [vmem:[%s1343_s1 + $0x8] sm:$0xff]   ;;  %v213_v42 = vlaneseq }
  0x27   :  { %870 = vmatprep.subr.bf16.mxu0 %v1105_v0  ;;  %886 = vmatprep.mubr.msk.bf16.mxu0 %vm1106_vm0, %v1105_v0  ;;  %v970_v3 = vld [vmem:[%s1343_s1 + $0x10] sm:$0xff]   ;;  %v971_v4 = vld [vmem:[%s1343_s1 + $0x18] sm:$0xff]   ;;  %v972_v5 = vld [vmem:[%s1343_s1 + $0x20] sm:$0xff]   ;;  %vm190_vm1 = vcmask 64512   ;;  %vm694_vm14 = vcmask 130048  }
  0x28   :  { %890 = vmatprep.subr.bf16.mxu1 %v1105_v0  ;;  %906 = vmatprep.mubr.msk.bf16.mxu1 %vm1106_vm0, %v1105_v0  ;;  %v973_v6 = vld [vmem:[%s1343_s1 + $0x28] sm:$0xff]   ;;  %v974_v7 = vld [vmem:[%s1343_s1 + $0x30] sm:$0xff]   ;;  %v975_v8 = vld [vmem:[%s1343_s1 + $0x38] sm:$0xff]   ;;  %v1256_v43 = vand.u32 127, %v213_v42 }
  0x29   :  { %871 = vmatpush3.bf16.msra.mxu0 %v968_v1  ;;  %v1203_v9 = vld [vmem:[%s1342_s0] sm:$0xff]   ;;  %v978_v35 = vld [vmem:[%s1344_s2 + $0x8] sm:$0xff]   ;;  %v979_v36 = vld [vmem:[%s1344_s2 + $0x10] sm:$0xff]  }
  0x2a   :  { %872 = vmatprep.subr.bf16.mxu0 %v1105_v0  ;;  %v977_v34 = vld [vmem:[%s1344_s2] sm:$0xff]   ;;  %v980_v37 = vld [vmem:[%s1344_s2 + $0x18] sm:$0xff]   ;;  %v982_v39 = vld [vmem:[%s1344_s2 + $0x28] sm:$0xff]  }
  0x2b   :  { %891 = vmatpush3.bf16.msra.mxu1 %v977_v34  ;;  %v981_v38 = vld [vmem:[%s1344_s2 + $0x20] sm:$0xff]   ;;  %v983_v40 = vld [vmem:[%s1344_s2 + $0x30] sm:$0xff]   ;;  %v984_v41 = vld [vmem:[%s1344_s2 + $0x38] sm:$0xff]   ;;  %s1108_s2 = smov [#allocation7]  }
  0x2c   :  { %892 = vmatprep.subr.bf16.mxu1 %v1105_v0  ;;  %v985_v63 = vld [vmem:[#allocation2] sm:$0xff]   ;;  %s777_s22 = sshll.u32 %s1108_s2, 4  ;;  %s778_s22 = int_to_ptr.vmem [resolvable:$true] %s777_s22 }
  0x2d   :  { %873 = vmatpush3.bf16.msra.mxu0 %v969_v2  ;;  %v997_v42 = vld [vmem:[#allocation5 + $0x20] sm:$0xff]   ;;  %s1073_s23 = scalar_lea.vmem %s778_s22, 128  ;;  %p1078_p3 = scmp.lt.s32.totalorder %s778_s22, %s778_s22 }
  0x2e   :  { %874 = vmatprep.subr.bf16.mxu0 %v1105_v0  ;;  %p1074_p2 = scmp.ne.s32.totalorder %s778_s22, %s1073_s23  ;;  %p1079_p4 = scmp.lt.s32.totalorder %s1073_s23, %s1073_s23 }
  0x2f   :  { %893 = vmatpush3.bf16.msra.mxu1 %v978_v35 }
  0x30   :  { %894 = vmatprep.subr.bf16.mxu1 %v1105_v0  ;;  %p1080_p5 = por %p1079_p4, %p1078_p3 }
  0x31   :  { %875 = vmatpush3.bf16.msra.mxu0 %v970_v3 }
  0x32   :  { %876 = vmatprep.subr.bf16.mxu0 %v1105_v0  ;;  %p1081_p6 = pnand %p1080_p5, %p1074_p2 }
  0x33   :  { %895 = vmatpush3.bf16.msra.mxu1 %v979_v36 }
  0x34   :  { %896 = vmatprep.subr.bf16.mxu1 %v1105_v0 }
  0x35   :  { %877 = vmatpush3.bf16.msra.mxu0 %v971_v4  ;;  %v986_v4 = vld [vmem:[#allocation2 + $0x8] sm:$0xff]  }
  0x36   :  { %878 = vmatprep.subr.bf16.mxu0 %v1105_v0 }
  0x37   :  { %897 = vmatpush3.bf16.msra.mxu1 %v980_v37 }
  0x38   :  { %898 = vmatprep.subr.bf16.mxu1 %v1105_v0 }
  0x39   :  { %879 = vmatpush3.bf16.msra.mxu0 %v972_v5 }
  0x3a   :  { %880 = vmatprep.subr.bf16.mxu0 %v1105_v0 }
  0x3b   :  { %899 = vmatpush3.bf16.msra.mxu1 %v981_v38  ;;  %v993_v38 = vld [vmem:[#allocation5] sm:$0xff]  }
  0x3c   :  { %900 = vmatprep.subr.bf16.mxu1 %v1105_v0 }
  0x3d   :  { %881 = vmatpush3.bf16.msra.mxu0 %v973_v6 }
  0x3e   :  { %882 = vmatprep.subr.bf16.mxu0 %v1105_v0 }
  0x3f   :  { %901 = vmatpush3.bf16.msra.mxu1 %v982_v39  ;;  %v994_v39 = vld [vmem:[#allocation5 + $0x8] sm:$0xff]  }
  0x40   :  { %902 = vmatprep.subr.bf16.mxu1 %v1105_v0 }
  0x41   :  { %883 = vmatpush3.bf16.msra.mxu0 %v974_v7  ;;  %v987_v7 = vld [vmem:[#allocation2 + $0x10] sm:$0xff]  }
  0x42   :  { %884 = vmatprep.subr.bf16.mxu0 %v1105_v0 }
  0x43   :  { %903 = vmatpush3.bf16.msra.mxu1 %v983_v40  ;;  %v995_v40 = vld [vmem:[#allocation5 + $0x10] sm:$0xff]  }
  0x44   :  { %904 = vmatprep.subr.bf16.mxu1 %v1105_v0 }
  0x45   :  { %885 = vmatpush3.bf16.msra.mxu0 %v975_v8  ;;  %v988_v8 = vld [vmem:[#allocation2 + $0x18] sm:$0xff]  }
  0x46   :  { %910 = vmatprep.subr.bf16.mxu0 %v1105_v0 }
  0x47   :  { %905 = vmatpush3.bf16.msra.mxu1 %v984_v41  ;;  %v996_v41 = vld [vmem:[#allocation5 + $0x18] sm:$0xff]  }
  0x48   :  { %887 = vmatmul.mubr.bf16.vlgmr.msra.gmra.mrb[0].mxu0 %v1203_v9  ;;  %930 = vmatprep.subr.bf16.mxu1 %v1105_v0 }
  0x49   :  { %926 = vmatprep.mubr.msk.bf16.mxu0 %vm1106_vm0, %v1105_v0  ;;  %911 = vmatpush3.bf16.msra.mxu0 %v985_v63 }
  0x4a   :  { %907 = vmatmul.mubr.bf16.vlgmr.msra.gmra.mrb[0].mxu1 %v1203_v9  ;;  %912 = vmatprep.subr.bf16.mxu0 %v1105_v0 }
  0x4b   :  { %946 = vmatprep.mubr.msk.bf16.mxu1 %vm1106_vm0, %v1105_v0  ;;  %931 = vmatpush3.bf16.msra.mxu1 %v993_v38 }
  0x4c   :  { %932 = vmatprep.subr.bf16.mxu1 %v1105_v0 }
  0x4d   :  { %913 = vmatpush3.bf16.msra.mxu0 %v986_v4 }
  0x4e   :  { %914 = vmatprep.subr.bf16.mxu0 %v1105_v0 }
  0x4f   :  { %933 = vmatpush3.bf16.msra.mxu1 %v994_v39 }
  0x50   :  { %934 = vmatprep.subr.bf16.mxu1 %v1105_v0 }
  0x51   :  { %915 = vmatpush3.bf16.msra.mxu0 %v987_v7 }
  0x52   :  { %916 = vmatprep.subr.bf16.mxu0 %v1105_v0 }
  0x53   :  { %935 = vmatpush3.bf16.msra.mxu1 %v995_v40 }
  0x54   :  { %936 = vmatprep.subr.bf16.mxu1 %v1105_v0 }
  0x55   :  { %917 = vmatpush3.bf16.msra.mxu0 %v988_v8 }
  0x56   :  { %918 = vmatprep.subr.bf16.mxu0 %v1105_v0 }
  0x57   :  { %937 = vmatpush3.bf16.msra.mxu1 %v996_v41 }
  0x58   :  { %938 = vmatprep.subr.bf16.mxu1 %v1105_v0 }
  0x5b   :  { %939 = vmatpush3.bf16.msra.mxu1 %v997_v42 }
  0x5c   :  { %940 = vmatprep.subr.bf16.mxu1 %v1105_v0 }
 0x11b   :  { %v183_v10 = vpop.f32.mrb[0].mxu0 }
 0x11c   :  { %v888_v11 = vpop.f32.mrb[1].mxu0  ;;  %v191_v12 = vsel %vm190_vm1, %v183_v10, -inf }
 0x11d   :  { %192 = vmax.xlane.f32.xlu0 %v191_v12  ;;  %v186_v13 = vpop.f32.mrb[2].mxu0  ;;  %v415_v62 = vpop.f32.mrb[0].mxu1  ;;  %v989_v11 = vld [vmem:[#allocation2 + $0x20] sm:$0xff]  }
 0x11e   :  { %v889_v14 = vpop.f32.mrb[3].mxu0  ;;  %v194_v15 = vsel %vm190_vm1, %v186_v13, -inf  ;;  %v810_v1 = vmul.f32 -1.442695, %v415_v62  ;;  %v908_v2 = vpop.f32.mrb[1].mxu1  ;;  %919 = vmatpush3.bf16.msra.mxu0 %v989_v11 }
 0x11f   :  { %v418_v3 = vpop.f32.mrb[2].mxu1  ;;  %v990_v14 = vld [vmem:[#allocation2 + $0x28] sm:$0xff]   ;;  %920 = vmatprep.subr.bf16.mxu0 %v1105_v0 }
 0x120   :  { %v811_v5 = vmul.f32 -1.442695, %v418_v3  ;;  %v909_v6 = vpop.f32.mrb[3].mxu1 }
 0x121   :  { %195 = vmax.xlane.f32.xlu0 %v194_v15  ;;  %v991_v15 = vld [vmem:[#allocation2 + $0x30] sm:$0xff]  }
 0x122   :  { %921 = vmatpush3.bf16.msra.mxu0 %v990_v14 }
 0x123   :  { %922 = vmatprep.subr.bf16.mxu0 %v1105_v0 }
 0x126   :  { %923 = vmatpush3.bf16.msra.mxu0 %v991_v15 }
 0x127   :  { %924 = vmatprep.subr.bf16.mxu0 %v1105_v0 }
 0x1aa   :  { %v193_v16 = vpop.xlane.xlu0 %192 }
 0x1ab   :  { %v197_v17 = vsub.f32 %v183_v10, %v193_v16 }
 0x1ad   :  { %v199_v18 = vmul.f32 1.442695, %v197_v17  ;;  %v992_v17 = vld [vmem:[#allocation2 + $0x38] sm:$0xff]  }
 0x1ae   :  { %v196_v19 = vpop.xlane.xlu0 %195  ;;  %925 = vmatpush3.bf16.msra.mxu0 %v992_v17 }
 0x1af   :  { %1001 = vpow2.f32 %v199_v18  ;;  %v198_v20 = vsub.f32 %v186_v13, %v196_v19 }
 0x1b1   :  { %v201_v21 = vmul.f32 1.442695, %v198_v20 }
 0x1b3   :  { %1003 = vpow2.f32 %v201_v21 }
 0x1b9   :  { %v1002_v22 = vpop.eup %1001 }
 0x1ba   :  { %v203_v23 = vsel %vm190_vm1, %v1002_v22, 0.0 }
 0x1bb   :  { %204 = vadd.xlane.f32.xlu1 %v203_v23 }
 0x1bd   :  { %v1004_v24 = vpop.eup %1003 }
 0x1be   :  { %v206_v25 = vsel %vm190_vm1, %v1004_v24, 0.0 }
 0x1bf   :  { %207 = vadd.xlane.f32.xlu1 %v206_v25 }
 0x248   :  { %v205_v26 = vpop.xlane.xlu1 %204 }
 0x249   :  { %1005 = vrcp.f32 %v205_v26 }
 0x24c   :  { %v208_v27 = vpop.xlane.xlu1 %207 }
 0x24d   :  { %1007 = vrcp.f32 %v208_v27 }
 0x24e   :  { %1009 = vpow2.f32 %v810_v1 }
 0x24f   :  { %1011 = vpow2.f32 %v811_v5 }
 0x253   :  { %v1006_v28 = vpop.eup %1005 }
 0x254   :  { %v1213_v29 = vmul.f32 %v1006_v28, %v1002_v22 }
 0x256   :  { %v215_v30 = vsel %vm190_vm1, %v1213_v29, -inf }
 0x257   :  { %v1008_v31 = vpop.eup %1007  ;;  %216 = vmax.xlane.f32.xlu0 %v215_v30 }
 0x258   :  { %v1217_v32 = vmul.f32 %v1008_v31, %v1004_v24  ;;  %v1010_v9 = vpop.eup %1009 }
 0x259   :  { %v428_v10 = vadd.f32 1.0, %v1010_v9  ;;  %v1012_v12 = vpop.eup %1011 }
 0x25a   :  { %v218_v33 = vsel %vm190_vm1, %v1217_v32, -inf  ;;  %v429_v13 = vadd.f32 1.0, %v1012_v12 }
 0x25b   :  { %219 = vmax.xlane.f32.xlu1 %v218_v33  ;;  %1013 = vrcp.f32 %v428_v10 }
 0x25c   :  { %1015 = vrcp.f32 %v429_v13 }
 0x265   :  { %v1014_v16 = vpop.eup %1013 }
 0x266   :  { %v434_v18 = vmul.f32 %v1014_v16, %v415_v62  ;;  %v1016_v19 = vpop.eup %1015 }
 0x267   :  { %v435_v20 = vmul.f32 %v1016_v19, %v418_v3 }
 0x269   :  { %v436_v21 = vpack.c.bf16 %v435_v20, %v434_v18  ;;  %v1107_v18 = vmov 0.0|0.0  }
 0x26a   :  { %957 = vmatprep.subr.bf16.mxu0 %v1107_v18 }
 0x26b   :  { %927 = vmatmul.mubr.bf16.vlgmr.msra.gmra.mrb[4].mxu0 %v436_v21 }
 0x26c   :  { %954 = vmatprep.mubr.msk.f32.mxu0 %vm1106_vm0, %v1105_v0 }
 0x2e4   :  { %v1258_v44 = vpop.xlane.xlu0 %216 }
 0x2e5   :  { %vm221_vm2 = vcmp.eq.f32.partialorder %v1213_v29, %v1258_v44 }
 0x2e6   :  { %v223_v45 = vsel %vm221_vm2, %v1256_v43, 8 }
 0x2e7   :  { %v225_v46 = vsel %vm190_vm1, %v223_v45, 2147483647  ;;  %v998_v45 = vld [vmem:[#allocation5 + $0x28] sm:$0xff]  }
 0x2e8   :  { %v1264_v47 = vpop.xlane.xlu1 %219  ;;  %v227_v48 = vshra.s32 %v225_v46, 16  ;;  %v226_v54 = vand.u32 65535, %v225_v46  ;;  %941 = vmatpush3.bf16.msra.mxu1 %v998_v45  ;;  %v999_v46 = vld [vmem:[#allocation5 + $0x30] sm:$0xff]  }
 0x2e9   :  { %vm222_vm3 = vcmp.eq.f32.partialorder %v1217_v32, %v1264_v47  ;;  %942 = vmatprep.subr.bf16.mxu1 %v1105_v0 }
 0x2ea   :  { %v224_v49 = vsel %vm222_vm3, %v1256_v43, 8  ;;  %v229_v50 = vcvt.s32.f32 %v227_v48  ;;  %v228_v56 = vcvt.s32.f32 %v226_v54  ;;  %v1000_v48 = vld [vmem:[#allocation5 + $0x38] sm:$0xff]  }
 0x2eb   :  { %v240_v51 = vsel %vm190_vm1, %v224_v49, 2147483647 }
 0x2ec   :  { %230 = vmin.xlane.f32.xlu0 %v229_v50  ;;  %v242_v52 = vshra.s32 %v240_v51, 16  ;;  %v241_v57 = vand.u32 65535, %v240_v51  ;;  %943 = vmatpush3.bf16.msra.mxu1 %v999_v46 }
 0x2ed   :  { %944 = vmatprep.subr.bf16.mxu1 %v1105_v0 }
 0x2ee   :  { %v244_v53 = vcvt.s32.f32 %v242_v52  ;;  %v243_v60 = vcvt.s32.f32 %v241_v57 }
 0x2f0   :  { %245 = vmin.xlane.f32.xlu1 %v244_v53  ;;  %945 = vmatpush3.bf16.msra.mxu1 %v1000_v48 }
 0x33e   :  { %v535_v49 = vpop.f32.mrb[4].mxu0 }
 0x33f   :  { %v928_v51 = vpop.f32.mrb[5].mxu0 }
 0x340   :  { %v538_v52 = vpop.f32.mrb[6].mxu0 }
 0x341   :  { %v929_v54 = vpop.f32.mrb[7].mxu0 }
 0x379   :  { %v231_v55 = vpop.xlane.xlu0 %230 }
 0x37a   :  { %vm232_vm4 = vcmp.eq.f32.partialorder %v229_v50, %v231_v55  ;;  %v237_v22 = vcvt.f32.s32 %v231_v55  ;;  %v820_v50 = vmul.f32 -1.442695, %v535_v49 }
 0x37b   :  { %v233_v58 = vsel %vm232_vm4, %v228_v56, inf }
 0x37c   :  { %234 = vmin.xlane.f32.xlu0 %v233_v58  ;;  %v238_v24 = vshll.u32 %v237_v22, 16  ;;  %1017 = vpow2.f32 %v820_v50 }
 0x37d   :  { %v246_v59 = vpop.xlane.xlu1 %245 }
 0x37e   :  { %vm247_vm5 = vcmp.eq.f32.partialorder %v244_v53, %v246_v59  ;;  %v252_v25 = vcvt.f32.s32 %v246_v59  ;;  %v821_v53 = vmul.f32 -1.442695, %v538_v52 }
 0x37f   :  { %v248_v61 = vsel %vm247_vm5, %v243_v60, inf }
 0x380   :  { %249 = vmin.xlane.f32.xlu1 %v248_v61  ;;  %v253_v30 = vshll.u32 %v252_v25, 16  ;;  %1019 = vpow2.f32 %v821_v53 }
 0x386   :  { %v1018_v55 = vpop.eup %1017 }
 0x387   :  { %v548_v56 = vadd.f32 1.0, %v1018_v55 }
 0x389   :  { %1021 = vrcp.f32 %v548_v56 }
 0x38a   :  { %v1020_v57 = vpop.eup %1019 }
 0x38b   :  { %v549_v58 = vadd.f32 1.0, %v1020_v57 }
 0x38d   :  { %1023 = vrcp.f32 %v549_v58 }
 0x393   :  { %v1022_v63 = vpop.eup %1021 }
 0x394   :  { %v554_v3 = vmul.f32 %v1022_v63, %v535_v49 }
 0x397   :  { %v1024_v4 = vpop.eup %1023 }
 0x398   :  { %v555_v7 = vmul.f32 %v1024_v4, %v538_v52 }
 0x39a   :  { %v556_v9 = vpack.c.bf16 %v555_v7, %v554_v3 }
 0x39c   :  { %947 = vmatmul.mubr.bf16.vlgmr.msra.gmra.mrb[4].mxu1 %v556_v9 }
 0x409   :  { %v235_v23 = vpop.xlane.xlu0 %234 }
 0x40a   :  { %v236_v26 = vcvt.f32.s32 %v235_v23 }
 0x40c   :  { %v1279_v27 = vadd.s32 %v238_v24, %v236_v26 }
 0x40d   :  { %v250_v28 = vpop.xlane.xlu1 %249 }
 0x40e   :  { %v251_v31 = vcvt.f32.s32 %v250_v28  ;;  %vm255_vm6 = vcmp.eq.s32.totalorder %v1256_v43, %v1279_v27 }
 0x40f   :  { %v1287_v33 = vsel %vm255_vm6, -inf, %v1213_v29 }
 0x410   :  { %v1289_v34 = vadd.s32 %v253_v30, %v251_v31  ;;  %v265_v35 = vsel %vm190_vm1, %v1287_v33, -inf }
 0x411   :  { %266 = vmax.xlane.f32.xlu0 %v265_v35 }
 0x412   :  { %vm256_vm7 = vcmp.eq.s32.totalorder %v1256_v43, %v1289_v34 }
 0x413   :  { %v1299_v36 = vsel %vm256_vm7, -inf, %v1217_v32  ;;  %v258_v48 = vsel %vm256_vm7, %v1217_v32, 0.0 }
 0x414   :  { %v268_v37 = vsel %vm190_vm1, %v1299_v36, -inf }
 0x415   :  { %269 = vmax.xlane.f32.xlu1 %v268_v37 }
 0x46f   :  { %v655_v19 = vpop.f32.mrb[4].mxu1 }
 0x470   :  { %v948_v20 = vpop.f32.mrb[5].mxu1 }
 0x471   :  { %v658_v21 = vpop.f32.mrb[6].mxu1 }
 0x472   :  { %v958_v22 = vpack.c.bf16 %v658_v21, %v655_v19  ;;  %v949_v23 = vpop.f32.mrb[7].mxu1 }
 0x474   :  { %959 = vmatpush3.bf16.msra.mxu0 %v958_v22 }
 0x49e   :  { %v267_v59 = vpop.xlane.xlu0 %266 }
 0x49f   :  { %vm271_vm8 = vcmp.eq.f32.partialorder %v1287_v33, %v267_v59  ;;  %v311_v24 = vadd.f32 %v267_v59, %v1258_v44  ;;  %v257_v44 = vsel %vm255_vm6, %v1213_v29, 0.0 }
 0x4a0   :  { %v273_v0 = vsel %vm271_vm8, %v1256_v43, 8 }
 0x4a1   :  { %v275_v60 = vsel %vm190_vm1, %v273_v0, 2147483647  ;;  %1025 = vrcp.f32 %v311_v24 }
 0x4a2   :  { %v270_v61 = vpop.xlane.xlu1 %269  ;;  %v277_v62 = vshra.s32 %v275_v60, 16  ;;  %v276_v10 = vand.u32 65535, %v275_v60 }
 0x4a3   :  { %vm272_vm9 = vcmp.eq.f32.partialorder %v1299_v36, %v270_v61  ;;  %v312_v26 = vadd.f32 %v270_v61, %v1264_v47 }
 0x4a4   :  { %v274_v1 = vsel %vm272_vm9, %v1256_v43, 8  ;;  %v279_v2 = vcvt.s32.f32 %v277_v62  ;;  %v278_v12 = vcvt.s32.f32 %v276_v10 }
 0x4a5   :  { %v290_v5 = vsel %vm190_vm1, %v274_v1, 2147483647  ;;  %1027 = vrcp.f32 %v312_v26 }
 0x4a6   :  { %280 = vmin.xlane.f32.xlu0 %v279_v2  ;;  %v292_v6 = vshra.s32 %v290_v5, 16  ;;  %v291_v13 = vand.u32 65535, %v290_v5 }
 0x4a8   :  { %v294_v8 = vcvt.s32.f32 %v292_v6  ;;  %v293_v16 = vcvt.s32.f32 %v291_v13 }
 0x4aa   :  { %295 = vmin.xlane.f32.xlu1 %v294_v8 }
 0x4ab   :  { %v1026_v45 = vpop.eup %1025 }
 0x4af   :  { %v1028_v51 = vpop.eup %1027 }
 0x533   :  { %v281_v11 = vpop.xlane.xlu0 %280 }
 0x534   :  { %vm282_vm10 = vcmp.eq.f32.partialorder %v279_v2, %v281_v11  ;;  %v287_v25 = vcvt.f32.s32 %v281_v11 }
 0x535   :  { %v283_v14 = vsel %vm282_vm10, %v278_v12, inf }
 0x536   :  { %284 = vmin.xlane.f32.xlu0 %v283_v14  ;;  %v288_v30 = vshll.u32 %v287_v25, 16 }
 0x537   :  { %v296_v15 = vpop.xlane.xlu1 %295 }
 0x538   :  { %vm297_vm11 = vcmp.eq.f32.partialorder %v294_v8, %v296_v15  ;;  %v302_v31 = vcvt.f32.s32 %v296_v15 }
 0x539   :  { %v298_v17 = vsel %vm297_vm11, %v293_v16, inf }
 0x53a   :  { %299 = vmin.xlane.f32.xlu1 %v298_v17  ;;  %v303_v39 = vshll.u32 %v302_v31, 16 }
 0x5c3   :  { %v285_v28 = vpop.xlane.xlu0 %284 }
 0x5c4   :  { %v286_v35 = vcvt.f32.s32 %v285_v28 }
 0x5c6   :  { %v289_v37 = vadd.s32 %v288_v30, %v286_v35 }
 0x5c7   :  { %v300_v38 = vpop.xlane.xlu1 %299 }
 0x5c8   :  { %vm305_vm12 = vcmp.eq.s32.totalorder %v1256_v43, %v289_v37  ;;  %v301_v40 = vcvt.f32.s32 %v300_v38 }
 0x5c9   :  { %v307_v41 = vsel %vm305_vm12, %v1287_v33, 0.0 }
 0x5ca   :  { %v304_v42 = vadd.s32 %v303_v39, %v301_v40  ;;  %v309_v47 = vadd.f32 %v307_v41, %v257_v44 }
 0x5cc   :  { %vm306_vm13 = vcmp.eq.s32.totalorder %v1256_v43, %v304_v42  ;;  %v315_v46 = vmul.f32 %v1026_v45, %v309_v47 }
 0x5cd   :  { %v308_v49 = vsel %vm306_vm13, %v1299_v36, 0.0 }
 0x5ce   :  { %v310_v50 = vadd.f32 %v308_v49, %v258_v48  ;;  %662 = vxpose.xlu0.b32.start [1/2] (short) (narrow) %v315_v46, 8 }
 0x5d0   :  { %v316_v27 = vmul.f32 %v1028_v51, %v310_v50 }
 0x5d2   :  { %663 = vxpose.xlu0.b32.end [2/2] (short) (narrow) %v316_v27, 8 }
 0x64e   :  { %v678_v29 = vpop.trf.xlu0 }
 0x64f   :  { %955 = vmatmul.mubr.msk.f32.vlgmr.msra.gmra.mrb[8].mxu0 %vm694_vm14, %v678_v29 }
 0x722   :  { %v764_v33 = vpop.f32.mrb[8].mxu0 }
 0x723   :  { %v956_v52 = vpop.f32.mrb[9].mxu0  ;;  %770 = vst [vmem:[#allocation7] sm:$0xff] %v764_v33 }
 0x724   :  { %1084 = shalt.err (!%p1081_p6)
}
 0x725   :  { %s1085_s26 = scalar_lea.hbm %s1347_s5, 128 }
 0x726   :  { %p1086_p7 = scmp.ne.s32.totalorder %s1347_s5, %s1085_s26  ;;  %p1089_p8 = scmp.lt.u32.totalorder %s1085_s26, %s1347_s5 }
 0x728   :  { %p1091_p9 = pnand %p1089_p8, %p1086_p7 }
 0x72a   :  { %1094 = shalt.err (!%p1091_p9)
}
 0x72b   :  { %780 = dma.vmem_to_hbm [thread:$0]  %s778_s22, 128, %s1347_s5, [#allocation4]  }
 0x72c   :  { %1099 = dma.done.wait [#allocation4], 128  }
 0x72d   :  { %1100 = vsyncadd [#allocation4], 4294967168 }
 0x72e   :  { %784 = vsyncpa [#allocation3], 1 }
 0x72f   :  { %785 = vsyncpa [#allocation6], 1 }
 0x730   :  { %786 = vsyncpa [#allocation4], 1 }

</bundles_post_ra>
